<compile_context>
chip_gen: v7x
topology: tpu7x:2x2x1
jax: 0.10.0
libtpu: 0.0.40
codegen_flags: <defaults>
</compile_context>

<pallas_src>
import jax
import jax.numpy as jnp
from jax.experimental import pallas as pl
from jax.experimental.pallas import tpu as pltpu

EPS = 1e-5


def _pick_lane_tile(n_lanes, c_in, vmem_budget_bytes=8 * 1024 * 1024):
    """Largest multiple-of-128 divisor of n_lanes whose double-buffered
    footprint (4 strided inputs + 1 pooled output, f32) fits the budget."""
    for t in (2048, 1024, 512, 256, 128):
        if n_lanes % t == 0 and (5 * 2 * c_in * t * 4) <= vmem_budget_bytes:
            return t
    return n_lanes  # tiny problem: single full-width block (allowed: full dim)


def _stats_pool_kernel(x00_ref, x01_ref, x10_ref, x11_ref,
                       pooled_ref, sum_ref, ssq_ref):
    # x??_ref: (Cin, TILE) strided 2x2-corner views of the raw input.
    i = pl.program_id(0)
    a = x00_ref[...]
    b = x01_ref[...]
    c = x10_ref[...]
    d = x11_ref[...]

    s4 = (a + b) + (c + d)                 # per-pixel 2x2 sum of raw x
    pooled_ref[...] = 0.25 * s4            # AvgPool2d(2) of the raw input

    @pl.when(i == 0)
    def _():
        sum_ref[...] = jnp.zeros_like(sum_ref)
        ssq_ref[...] = jnp.zeros_like(ssq_ref)

    # Single sweep: per-channel sum and sum-of-squares of the UNPOOLED input.
    sum_ref[...] += jnp.sum(s4, axis=1, keepdims=True)
    ssq_ref[...] += jnp.sum(a * a + b * b + c * c + d * d, axis=1, keepdims=True)


def _affine_matmul_kernel(w_ref, b_ref, xp_ref, o_ref):
    # out = W' @ pooled + b'  (BN affine folded into W'/b'); lane-dense output.
    # TODO(synk): optionally cast to bf16 for the MXU when tolerance allows.
    o_ref[...] = (
        jnp.dot(w_ref[...], xp_ref[...], preferred_element_type=jnp.float32)
        + b_ref[...]
    ).astype(o_ref.dtype)


def transition_layer(x_nchw, gamma, beta, conv_w, conv_b):
    """x_nchw: (N, Cin, H, W) float32. Returns (N, Cout, H//2, W//2) float32."""
    N, Cin, H, W = x_nchw.shape
    assert H % 2 == 0 and W % 2 == 0, "AvgPool2d(2) path expects even H, W"
    Cout = conv_w.shape[0]
    Ho, Wo = H // 2, W // 2
    R_out = N * Ho * Wo          # pooled pixels  (lane axis)
    R_in = N * H * W             # raw pixels     (BN statistics population)

    # Glue: channels-on-sublanes / pixels-on-lanes layout for the 4 corners.
    x_t = jnp.transpose(x_nchw, (1, 0, 2, 3))              # (Cin, N, H, W)
    corners = (
        x_t[:, :, 0::2, 0::2], x_t[:, :, 0::2, 1::2],
        x_t[:, :, 1::2, 0::2], x_t[:, :, 1::2, 1::2],
    )
    corners = tuple(c.reshape(Cin, R_out) for c in corners)

    tile = _pick_lane_tile(R_out, Cin)
    grid = (R_out // tile,)

    # ---- Pass 1: pooled x + per-channel sum / sum-of-squares (one sweep) ----
    pooled, ch_sum, ch_ssq = pl.pallas_call(
        _stats_pool_kernel,
        out_shape=(
            jax.ShapeDtypeStruct((Cin, R_out), jnp.float32),
            jax.ShapeDtypeStruct((Cin, 1), jnp.float32),
            jax.ShapeDtypeStruct((Cin, 1), jnp.float32),
        ),
        grid_spec=pltpu.PrefetchScalarGridSpec(
            num_scalar_prefetch=0,
            grid=grid,
            in_specs=[pl.BlockSpec((Cin, tile), lambda i: (0, i))] * 4,
            out_specs=(
                pl.BlockSpec((Cin, tile), lambda i: (0, i)),
                pl.BlockSpec((Cin, 1), lambda i: (0, 0)),   # resident accumulator
                pl.BlockSpec((Cin, 1), lambda i: (0, 0)),   # resident accumulator
            ),
        ),
        compiler_params=pltpu.CompilerParams(
            dimension_semantics=("arbitrary",),   # accumulators across tiles
            vmem_limit_bytes=32 * 1024 * 1024,
        ),
    )(*corners)

    # ---- Tiny O(C) fold of the BN affine into the 1x1 conv (XLA glue) ----
    mean = ch_sum[:, 0] / R_in
    var = jnp.maximum(ch_ssq[:, 0] / R_in - mean * mean, 0.0)   # biased (train mode)
    scale = gamma * jax.lax.rsqrt(var + EPS)                    # (Cin,)
    shift = beta - mean * scale                                 # (Cin,)
    w2d = conv_w.reshape(Cout, Cin)
    w_fold = w2d * scale[None, :]                               # (Cout, Cin)
    b_fold = (w2d @ shift + conv_b).reshape(Cout, 1)            # (Cout, 1)

    # ---- Pass 2: streamed folded-affine matmul on the pooled tensor ----
    out2d = pl.pallas_call(
        _affine_matmul_kernel,
        out_shape=jax.ShapeDtypeStruct((Cout, R_out), jnp.float32),
        grid_spec=pltpu.PrefetchScalarGridSpec(
            num_scalar_prefetch=0,
            grid=grid,
            in_specs=[
                pl.BlockSpec((Cout, Cin), lambda i: (0, 0)),    # resident W'
                pl.BlockSpec((Cout, 1), lambda i: (0, 0)),      # resident b'
                pl.BlockSpec((Cin, tile), lambda i: (0, i)),
            ],
            out_specs=pl.BlockSpec((Cout, tile), lambda i: (0, i)),
        ),
        compiler_params=pltpu.CompilerParams(
            dimension_semantics=("parallel",),     # independent tiles -> megacore
            vmem_limit_bytes=32 * 1024 * 1024,
        ),
    )(w_fold, b_fold, pooled)

    # Glue: (Cout, N*Ho*Wo) -> (N, Cout, Ho, Wo)
    out = out2d.reshape(Cout, N, Ho, Wo)
    return jnp.transpose(out, (1, 0, 2, 3))


def reference_transition_layer(x_nchw, gamma, beta, conv_w, conv_b):
    """Pure-JAX reference matching PyTorch training-mode forward."""
    mean = jnp.mean(x_nchw, axis=(0, 2, 3), keepdims=True)
    var = jnp.mean((x_nchw - mean) ** 2, axis=(0, 2, 3), keepdims=True)
    y = (x_nchw - mean) * jax.lax.rsqrt(var + EPS)
    y = y * gamma[None, :, None, None] + beta[None, :, None, None]
    z = jnp.einsum("nchw,oc->nohw", y, conv_w.reshape(conv_w.shape[0], conv_w.shape[1]))
    z = z + conv_b[None, :, None, None]
    N, Co, H, W = z.shape
    z = z.reshape(N, Co, H // 2, 2, W // 2, 2)
    return jnp.mean(z, axis=(3, 5))


if __name__ == "__main__":
    key = jax.random.PRNGKey(0)
    kx, kw, kb, kg, kbe = jax.random.split(key, 5)

    N, C_in, H, W = 2, 4, 16, 16
    C_out = 8

    x = jax.random.normal(kx, (N, C_in, H, W), dtype=jnp.float32)

    # BatchNorm2d params (perturbed from default init to exercise the fold):
    gamma = 1.0 + 0.1 * jax.random.normal(kg, (C_in,), dtype=jnp.float32)
    beta = 0.1 * jax.random.normal(kbe, (C_in,), dtype=jnp.float32)
    # Conv2d(C_in, C_out, kernel_size=1): weight (C_out, C_in, 1, 1), bias (C_out,)
    conv_w = jax.random.normal(kw, (C_out, C_in, 1, 1), dtype=jnp.float32) * 0.1
    conv_b = jax.random.normal(kb, (C_out,), dtype=jnp.float32) * 0.1

    out = transition_layer(x, gamma, beta, conv_w, conv_b)
    out = jax.block_until_ready(out)

    ref = reference_transition_layer(x, gamma, beta, conv_w, conv_b)
    assert out.shape == (N, C_out, H // 2, W // 2), out.shape
    max_err = float(jnp.max(jnp.abs(out - ref)))
    assert jnp.allclose(out, ref, atol=1e-4, rtol=1e-4), max_err

    print("KERNEL_OK")
</pallas_src>

<mosaic_0001>
module attributes {stable_mosaic.version = 11 : i64} {
  func.func @_stats_pool_kernel(%arg0: i32, %arg1: memref<4x128xf32, #tpu.memory_space<vmem>>, %arg2: memref<4x128xf32, #tpu.memory_space<vmem>>, %arg3: memref<4x128xf32, #tpu.memory_space<vmem>>, %arg4: memref<4x128xf32, #tpu.memory_space<vmem>>, %arg5: memref<4x128xf32, #tpu.memory_space<vmem>>, %arg6: memref<4x1xf32, #tpu.memory_space<vmem>>, %arg7: memref<4x1xf32, #tpu.memory_space<vmem>>) attributes {dimension_semantics = [#tpu.dimension_semantics<arbitrary>], iteration_bounds = array<i64: 1>, scalar_prefetch = 0 : i64, scratch_operands = 0 : i64, tpu.core_type = #tpu.core_type<tc>, window_params = [{transform_indices = @transform_0, window_bounds = array<i64: 4, 128>}, {transform_indices = @transform_1, window_bounds = array<i64: 4, 128>}, {transform_indices = @transform_2, window_bounds = array<i64: 4, 128>}, {transform_indices = @transform_3, window_bounds = array<i64: 4, 128>}, {transform_indices = @transform_4, window_bounds = array<i64: 4, 128>}, {pipeline_mode = #tpu.pipeline_mode<synchronous>, transform_indices = @transform_5, window_bounds = array<i64: 4, 1>}, {pipeline_mode = #tpu.pipeline_mode<synchronous>, transform_indices = @transform_6, window_bounds = array<i64: 4, 1>}]} {
    %c0 = arith.constant 0 : index
    %c0_0 = arith.constant 0 : index
    %0 = vector.load %arg1[%c0, %c0_0] : memref<4x128xf32, #tpu.memory_space<vmem>>, vector<4x128xf32>
    %c0_1 = arith.constant 0 : index
    %c0_2 = arith.constant 0 : index
    %1 = vector.load %arg2[%c0_1, %c0_2] : memref<4x128xf32, #tpu.memory_space<vmem>>, vector<4x128xf32>
    %c0_3 = arith.constant 0 : index
    %c0_4 = arith.constant 0 : index
    %2 = vector.load %arg3[%c0_3, %c0_4] : memref<4x128xf32, #tpu.memory_space<vmem>>, vector<4x128xf32>
    %c0_5 = arith.constant 0 : index
    %c0_6 = arith.constant 0 : index
    %3 = vector.load %arg4[%c0_5, %c0_6] : memref<4x128xf32, #tpu.memory_space<vmem>>, vector<4x128xf32>
    %4 = arith.addf %0, %1 : vector<4x128xf32>
    %5 = arith.addf %2, %3 : vector<4x128xf32>
    %6 = arith.addf %4, %5 : vector<4x128xf32>
    %cst = arith.constant 2.500000e-01 : f32
    %7 = vector.broadcast %cst : f32 to vector<4x128xf32>
    %8 = arith.mulf %7, %6 : vector<4x128xf32>
    %c0_7 = arith.constant 0 : index
    %c0_8 = arith.constant 0 : index
    %9 = vector.load %arg5[%c0_7, %c0_8] : memref<4x128xf32, #tpu.memory_space<vmem>>, vector<4x128xf32>
    tpu.vector_store %arg5[%c0_7, %c0_8], %8 {strides = array<i32>} : memref<4x128xf32, #tpu.memory_space<vmem>>, vector<4x128xf32>,
    %c0_i32 = arith.constant 0 : i32
    %10 = arith.cmpi eq, %arg0, %c0_i32 : i32
    %11 = arith.extui %10 : i1 to i32
    %c0_i32_9 = arith.constant 0 : i32
    %12 = arith.cmpi ne, %11, %c0_i32_9 : i32
    scf.if %12 {
      %cst_20 = arith.constant 0.000000e+00 : f32
      %30 = vector.broadcast %cst_20 : f32 to vector<4x1xf32>
      %c0_21 = arith.constant 0 : index
      %c0_22 = arith.constant 0 : index
      %31 = vector.load %arg6[%c0_21, %c0_22] : memref<4x1xf32, #tpu.memory_space<vmem>>, vector<4x1xf32>
      tpu.vector_store %arg6[%c0_21, %c0_22], %30 {strides = array<i32>} : memref<4x1xf32, #tpu.memory_space<vmem>>, vector<4x1xf32>,
      %cst_23 = arith.constant 0.000000e+00 : f32
      %32 = vector.broadcast %cst_23 : f32 to vector<4x1xf32>
      %c0_24 = arith.constant 0 : index
      %c0_25 = arith.constant 0 : index
      %33 = vector.load %arg7[%c0_24, %c0_25] : memref<4x1xf32, #tpu.memory_space<vmem>>, vector<4x1xf32>
      tpu.vector_store %arg7[%c0_24, %c0_25], %32 {strides = array<i32>} : memref<4x1xf32, #tpu.memory_space<vmem>>, vector<4x1xf32>,
    } else {
    }
    %c0_10 = arith.constant 0 : index
    %c0_11 = arith.constant 0 : index
    %13 = vector.load %arg6[%c0_10, %c0_11] : memref<4x1xf32, #tpu.memory_space<vmem>>, vector<4x1xf32>
    %cst_12 = arith.constant dense<0.000000e+00> : vector<4xf32>
    %14 = vector.multi_reduction <add>, %6, %cst_12 [1] : vector<4x128xf32> to vector<4xf32>
    %15 = vector.shape_cast %14 : vector<4xf32> to vector<4x1xf32>
    %16 = arith.addf %13, %15 : vector<4x1xf32>
    %c0_13 = arith.constant 0 : index
    %c0_14 = arith.constant 0 : index
    %17 = vector.load %arg6[%c0_13, %c0_14] : memref<4x1xf32, #tpu.memory_space<vmem>>, vector<4x1xf32>
    tpu.vector_store %arg6[%c0_13, %c0_14], %16 {strides = array<i32>} : memref<4x1xf32, #tpu.memory_space<vmem>>, vector<4x1xf32>,
    %c0_15 = arith.constant 0 : index
    %c0_16 = arith.constant 0 : index
    %18 = vector.load %arg7[%c0_15, %c0_16] : memref<4x1xf32, #tpu.memory_space<vmem>>, vector<4x1xf32>
    %19 = arith.mulf %0, %0 : vector<4x128xf32>
    %20 = arith.mulf %1, %1 : vector<4x128xf32>
    %21 = arith.addf %19, %20 : vector<4x128xf32>
    %22 = arith.mulf %2, %2 : vector<4x128xf32>
    %23 = arith.addf %21, %22 : vector<4x128xf32>
    %24 = arith.mulf %3, %3 : vector<4x128xf32>
    %25 = arith.addf %23, %24 : vector<4x128xf32>
    %cst_17 = arith.constant dense<0.000000e+00> : vector<4xf32>
    %26 = vector.multi_reduction <add>, %25, %cst_17 [1] : vector<4x128xf32> to vector<4xf32>
    %27 = vector.shape_cast %26 : vector<4xf32> to vector<4x1xf32>
    %28 = arith.addf %18, %27 : vector<4x1xf32>
    %c0_18 = arith.constant 0 : index
    %c0_19 = arith.constant 0 : index
    %29 = vector.load %arg7[%c0_18, %c0_19] : memref<4x1xf32, #tpu.memory_space<vmem>>, vector<4x1xf32>
    tpu.vector_store %arg7[%c0_18, %c0_19], %28 {strides = array<i32>} : memref<4x1xf32, #tpu.memory_space<vmem>>, vector<4x1xf32>,
    return
  }
  func.func @transform_0(%arg0: i32) -> (i32, i32) {
    %c0_i32 = arith.constant 0 : i32
    %c0_i32_0 = arith.constant 0 : i32
    return %c0_i32, %arg0 : i32, i32
  }
  func.func @transform_1(%arg0: i32) -> (i32, i32) {
    %c0_i32 = arith.constant 0 : i32
    %c0_i32_0 = arith.constant 0 : i32
    return %c0_i32, %arg0 : i32, i32
  }
  func.func @transform_2(%arg0: i32) -> (i32, i32) {
    %c0_i32 = arith.constant 0 : i32
    %c0_i32_0 = arith.constant 0 : i32
    return %c0_i32, %arg0 : i32, i32
  }
  func.func @transform_3(%arg0: i32) -> (i32, i32) {
    %c0_i32 = arith.constant 0 : i32
    %c0_i32_0 = arith.constant 0 : i32
    return %c0_i32, %arg0 : i32, i32
  }
  func.func @transform_4(%arg0: i32) -> (i32, i32) {
    %c0_i32 = arith.constant 0 : i32
    %c0_i32_0 = arith.constant 0 : i32
    return %c0_i32, %arg0 : i32, i32
  }
  func.func @transform_5(%arg0: i32) -> (i32, i32) {
    %c0_i32 = arith.constant 0 : i32
    %c0_i32_0 = arith.constant 0 : i32
    %c0_i32_1 = arith.constant 0 : i32
    return %c0_i32, %c0_i32_0 : i32, i32
  }
  func.func @transform_6(%arg0: i32) -> (i32, i32) {
    %c0_i32 = arith.constant 0 : i32
    %c0_i32_0 = arith.constant 0 : i32
    %c0_i32_1 = arith.constant 0 : i32
    return %c0_i32, %c0_i32_0 : i32, i32
  }
}

</mosaic_0001>

<bundles_post_ra>
// kernel: tpu_custom_call.1
= control target key start
LH: loop header
LB: loop body
LE: loop exit
PB: predicated region body
PF: predicated region fallthrough
CT: control target
= control target key end

     0   :  { %12 = vsyncpa [#allocation3], 0  ;;  %s285_s0 = inlined_call_operand.hbm [shape: f32[4,128], index: 0, kind: input, shape index: {}]   ;;  %s286_s1 = inlined_call_operand.hbm [shape: f32[4,128], index: 1, kind: input, shape index: {}]   ;;  %s287_s2 = inlined_call_operand.vmem [shape: f32[4,128], index: 2, kind: input, shape index: {}]   ;;  %s288_s3 = inlined_call_operand.vmem [shape: f32[4,128], index: 3, kind: input, shape index: {}]   ;;  %s289_s4 = inlined_call_operand.hbm [shape: f32[4,128], index: 4, kind: output, shape index: {0}]   ;;  %s290_s5 = inlined_call_operand.vmem [shape: f32[4,1], index: 5, kind: output, shape index: {1}]   ;;  %s291_s6 = inlined_call_operand.vmem [shape: f32[4,1], index: 6, kind: output, shape index: {2}]  }
   0x1   :  { %13 = vsyncpa [#allocation6], 0 }
   0x2   :  { %14 = vsyncpa [#allocation4], 0  ;;  %s182_s21 = smov [#allocation2]   ;;  %s183_s23 = smov [#allocation5]  }
   0x3   :  { %s21_s22 = sshll.u32 %s182_s21, 4  ;;  %s31_s24 = sshll.u32 %s183_s23, 4  ;;  %s22_s22 = int_to_ptr.vmem [resolvable:$true] %s21_s22  ;;  %s32_s24 = int_to_ptr.vmem [resolvable:$true] %s31_s24 }
   0x4   :  { %s110_s27 = scalar_lea.hbm %s285_s0, 64 }
   0x5   :  { %p111_p0 = scmp.ne.s32.totalorder %s285_s0, %s110_s27  ;;  %p114_p1 = scmp.lt.u32.totalorder %s110_s27, %s285_s0 }
   0x7   :  { %p116_p2 = pnand %p114_p1, %p111_p0 }
   0x9   :  { %119 = shalt.err (!%p116_p2)
}
   0xa   :  { %s120_s8 = scalar_lea.vmem %s22_s22, 64  ;;  %p125_p4 = scmp.lt.s32.totalorder %s22_s22, %s22_s22 }
   0xb   :  { %p121_p3 = scmp.ne.s32.totalorder %s22_s22, %s120_s8  ;;  %p126_p5 = scmp.lt.s32.totalorder %s120_s8, %s120_s8 }
   0xd   :  { %p127_p6 = por %p126_p5, %p125_p4 }
   0xf   :  { %p128_p7 = pnand %p127_p6, %p121_p3 }
  0x11   :  { %131 = shalt.err (!%p128_p7)
}
  0x12   :  { %24 = dma.hbm_to_vmem [thread:$0]  %s285_s0, 64, %s22_s22, [#allocation3]  }
  0x13   :  { %s132_s13 = scalar_lea.hbm %s286_s1, 64 }
  0x14   :  { %p133_p8 = scmp.ne.s32.totalorder %s286_s1, %s132_s13  ;;  %p136_p9 = scmp.lt.u32.totalorder %s132_s13, %s286_s1 }
  0x16   :  { %p138_p10 = pnand %p136_p9, %p133_p8 }
  0x18   :  { %141 = shalt.err (!%p138_p10)
}
  0x19   :  { %s142_s18 = scalar_lea.vmem %s32_s24, 64  ;;  %p147_p12 = scmp.lt.s32.totalorder %s32_s24, %s32_s24 }
  0x1a   :  { %p143_p11 = scmp.ne.s32.totalorder %s32_s24, %s142_s18  ;;  %p148_p13 = scmp.lt.s32.totalorder %s142_s18, %s142_s18 }
  0x1c   :  { %p149_p0 = por %p148_p13, %p147_p12 }
  0x1e   :  { %p150_p1 = pnand %p149_p0, %p143_p11 }
  0x20   :  { %153 = shalt.err (!%p150_p1)
}
  0x21   :  { %34 = dma.hbm_to_vmem [thread:$0]  %s286_s1, 64, %s32_s24, [#allocation6]  }
  0x22   :  { %176 = dma.done.wait [#allocation3], 64  }
  0x23   :  { %177 = vsyncadd [#allocation3], 4294967232 }
  0x24   :  { %178 = dma.done.wait [#allocation6], 64  }
  0x25   :  { %179 = vsyncadd [#allocation6], 4294967232  ;;  %vm58_vm0 = vcmask 3072   ;;  %v184_v0 = vmov 0.0   ;;  %v45_v1 = vld [vmem:[#allocation2] sm:$0xf] }
  0x26   :  { %59 = vst.msk [vmem:[%s290_s5] sm:$0xf] %vm58_vm0, %v184_v0  ;;  %60 = vst.msk [vmem:[%s291_s6] sm:$0xf] %vm58_vm0, %v184_v0  ;;  %v46_v2 = vld [vmem:[#allocation5] sm:$0xf]  ;;  %v70_v6 = vmul.f32 %v45_v1, %v45_v1 }
  0x27   :  { %v47_v3 = vld [vmem:[%s287_s2] sm:$0xf]  ;;  %v49_v5 = vadd.f32 %v46_v2, %v45_v1  ;;  %v71_v7 = vmul.f32 %v46_v2, %v46_v2  ;;  %vm62_vm1 = vcmask 1043456   ;;  %s185_s2 = smov [#allocation7]  }
  0x28   :  { %v48_v4 = vld [vmem:[%s288_s3] sm:$0xf]  ;;  %v73_v8 = vmul.f32 %v47_v3, %v47_v3  ;;  %s88_s27 = sshll.u32 %s185_s2, 4  ;;  %s89_s27 = int_to_ptr.vmem [resolvable:$true] %s88_s27 }
  0x29   :  { %v50_v9 = vadd.f32 %v48_v4, %v47_v3  ;;  %v72_v10 = vadd.f32 %v71_v7, %v70_v6  ;;  %v75_v11 = vmul.f32 %v48_v4, %v48_v4  ;;  %s154_s3 = scalar_lea.vmem %s89_s27, 64  ;;  %p159_p3 = scmp.lt.s32.totalorder %s89_s27, %s89_s27 }
  0x2a   :  { %p155_p2 = scmp.ne.s32.totalorder %s89_s27, %s154_s3  ;;  %p160_p4 = scmp.lt.s32.totalorder %s154_s3, %s154_s3 }
  0x2b   :  { %v51_v12 = vadd.f32 %v50_v9, %v49_v5  ;;  %v74_v13 = vadd.f32 %v73_v8, %v72_v10 }
  0x2c   :  { %p161_p5 = por %p160_p4, %p159_p3 }
  0x2d   :  { %v63_v14 = vsel %vm62_vm1, %v51_v12, 0.0  ;;  %v76_v15 = vadd.f32 %v75_v11, %v74_v13  ;;  %v52_v17 = vmul.f32 0.25, %v51_v12 }
  0x2e   :  { %64 = vadd.xlane.f32.xlu0 %v63_v14  ;;  %p162_p6 = pnand %p161_p5, %p155_p2 }
  0x2f   :  { %v77_v16 = vsel %vm62_vm1, %v76_v15, 0.0  ;;  %53 = vst [vmem:[#allocation7] sm:$0xf] %v52_v17 }
  0x32   :  { %78 = vadd.xlane.f32.xlu0 %v77_v16 }
  0x33   :  { %165 = shalt.err (!%p162_p6)
}
  0x34   :  { %s166_s30 = scalar_lea.hbm %s289_s4, 64 }
  0x35   :  { %p167_p7 = scmp.ne.s32.totalorder %s289_s4, %s166_s30  ;;  %p170_p8 = scmp.lt.u32.totalorder %s166_s30, %s289_s4 }
  0x37   :  { %p172_p9 = pnand %p170_p8, %p167_p7 }
  0x39   :  { %175 = shalt.err (!%p172_p9)
}
  0x3a   :  { %91 = dma.vmem_to_hbm [thread:$0]  %s89_s27, 64, %s289_s4, [#allocation4]   ;;  %v61_v18 = vld [vmem:[%s290_s5] sm:$0xf] }
  0x3b   :  { %v69_v21 = vld [vmem:[%s291_s6] sm:$0xf] }
  0xbb   :  { %v65_v19 = vpop.xlane.xlu0 %64 }
  0xbc   :  { %v66_v20 = vadd.f32 %v65_v19, %v61_v18 }
  0xbe   :  { %68 = vst.msk [vmem:[%s290_s5] sm:$0xf] %vm58_vm0, %v66_v20 }
  0xbf   :  { %v79_v22 = vpop.xlane.xlu0 %78 }
  0xc0   :  { %v80_v23 = vadd.f32 %v79_v22, %v69_v21 }
  0xc2   :  { %81 = vst.msk [vmem:[%s291_s6] sm:$0xf] %vm58_vm0, %v80_v23 }
  0xc3   :  { %180 = dma.done.wait [#allocation4], 64  }
  0xc4   :  { %181 = vsyncadd [#allocation4], 4294967232 }
  0xc5   :  { %103 = vsyncpa [#allocation3], 1 }
  0xc6   :  { %104 = vsyncpa [#allocation6], 1 }
  0xc7   :  { %105 = vsyncpa [#allocation4], 1 }

</bundles_post_ra>
